<compile_context>
chip_gen: v6e
topology: v6e:2x2x1
jax: 0.10.0
libtpu: 0.0.40
codegen_flags: <defaults>
</compile_context>

<pallas_src>
import functools
import math as m

import jax
import jax.numpy as jnp
from jax.experimental import pallas as pl
from jax.experimental.pallas import tpu as pltpu

FIFTY_PERCENT_STD = 0.8696735925295497
LANES = 128
MAX_TILE_ROWS = 1024     # (1024, 128) f32 block = 512 KiB per buffer


# ---------------------------------------------------------------------------
# Trace-time scalar helpers (pure Python, zero runtime cost)
# ---------------------------------------------------------------------------
def _erfi(x):
    """Imaginary error function via Maclaurin series (matches scipy.special.erfi,
    which is what the reference module's `erfi` resolves to)."""
    total, n, fact = 0.0, 0, 1.0
    while True:
        term = x ** (2 * n + 1) / (fact * (2 * n + 1))
        total += term
        if abs(term) < 1e-16 * max(abs(total), 1e-30):
            break
        n += 1
        fact *= n
    return 2.0 / m.sqrt(m.pi) * total


def percentile_to_std(percentile):
    return m.sqrt(2.0) * _erfi(percentile)


def _round_up(a, b):
    return (a + b - 1) // b * b


# ---------------------------------------------------------------------------
# Phase 1: tiled global reduction — per-lane partial sum / sum-of-squares.
# The (2, 128) output block index is constant, so it stays VMEM-resident
# across the whole (arbitrary) grid axis (accumulator pattern).
# ---------------------------------------------------------------------------
def _stats_kernel(x_ref, stats_ref):
    @pl.when(pl.program_id(0) == 0)
    def _init():
        stats_ref[...] = jnp.zeros_like(stats_ref)

    xf = x_ref[...].astype(jnp.float32)
    part = jnp.concatenate(
        [jnp.sum(xf, axis=0, keepdims=True),          # row 0: sum(x)
         jnp.sum(xf * xf, axis=0, keepdims=True)],    # row 1: sum(x^2)
        axis=0)
    stats_ref[...] += part


# ---------------------------------------------------------------------------
# Phase 2: tiled elementwise RNG + mask.
# ---------------------------------------------------------------------------
def _mask_kernel(seed_ref, params_ref, x_ref, o_ref, *, erf_arg_scale, tile_rows):
    i = pl.program_id(0)
    inv_std = params_ref[0]          # 1 / std   (f32 scalar, SMEM prefetch)
    mean = params_ref[1]             # mean used by the reference formula

    x = x_ref[...]                   # native dtype (kept values pass through exactly)
    xf = x.astype(jnp.float32)

    # Portable counter-based uniform RNG ("lowbias32"-style mixer). The global
    # element index makes every tile's stream distinct (seed mixing per review).
    seed_u = seed_ref[0].astype(jnp.uint32)
    row = jax.lax.broadcasted_iota(jnp.int32, x.shape, 0) + i * tile_rows
    lane = jax.lax.broadcasted_iota(jnp.int32, x.shape, 1)
    h = (row * LANES + lane).astype(jnp.uint32) + seed_u * jnp.uint32(0x9E3779B9)
    h = (h ^ (h >> 16)) * jnp.uint32(0x7FEB352D)
    h = (h ^ (h >> 15)) * jnp.uint32(0x846CA68B)
    h = h ^ (h >> 16)
    v = ((h & jnp.uint32(0x00FFFFFF)).astype(jnp.int32).astype(jnp.float32)
         + 0.5) * (1.0 / 16777216.0)                     # uniform in (0, 1)

    # Reference:
    #   normalized = |x/std - mean| / FIFTY_PERCENT_STD
    #   renorm     = normalized * z,  z ~ N(0,1);  zero where renorm < goal_std
    # Equivalent Bernoulli draw (no inverse-normal CDF needed):
    #   P(keep) = P(z >= goal_std/normalized) = 0.5 * erfc(arg)
    #   arg     = goal_std * FIFTY_PERCENT_STD / (sqrt(2) * |x*inv_std - mean|)
    #   keep   <=>  erfc(arg) >= 2 * v
    den = jnp.abs(xf * inv_std - mean)
    arg = erf_arg_scale / den                  # >= 0; +inf when den == 0 -> never keep
    # erfc(arg) via Abramowitz & Stegun 7.1.26 (valid for arg >= 0, |err| < 1.5e-7)
    k = 1.0 / (1.0 + 0.3275911 * arg)
    poly = ((((1.061405429 * k - 1.453152027) * k + 1.421413741) * k
             - 0.284496736) * k + 0.254829592) * k
    erfc = poly * jnp.exp(-arg * arg)

    keep = erfc >= 2.0 * v
    o_ref[...] = jnp.where(keep, x, jnp.zeros_like(x))


# ---------------------------------------------------------------------------
# Wrapper
# ---------------------------------------------------------------------------
def rand_sparse(x, seed, avg_percent_activation=0.05, mean=None):
    """RandSparse forward. Returns dense output (see TODO(synk) at top)."""
    goal_std = percentile_to_std(1.0 - avg_percent_activation)
    erf_arg_scale = float(goal_std) * FIFTY_PERCENT_STD / m.sqrt(2.0)

    orig_shape = x.shape
    dtype = x.dtype
    n_true = x.size
    assert n_true > 1, "need at least 2 elements for an unbiased std"

    # Flatten row-major to a lane-dense 2D slab; zero-pad so every
    # (tile_rows, 128) block is fully in bounds (zero padding does not change
    # sum or sum-of-squares, and padded outputs are sliced off afterwards).
    rows = pl.cdiv(n_true, LANES)
    tile_rows = min(MAX_TILE_ROWS, _round_up(rows, 8))
    rows_padded = _round_up(rows, tile_rows)
    pad = rows_padded * LANES - n_true
    flat = x.reshape(-1)
    if pad:
        flat = jnp.pad(flat, (0, pad))
    x2d = flat.reshape(rows_padded, LANES)
    num_tiles = rows_padded // tile_rows
    itemsize = jnp.dtype(dtype).itemsize

    # ---- phase 1: fused one-sweep global sum / sum(x^2) reduction --------------
    stats = pl.pallas_call(
        _stats_kernel,
        out_shape=jax.ShapeDtypeStruct((2, LANES), jnp.float32),
        grid_spec=pltpu.PrefetchScalarGridSpec(
            num_scalar_prefetch=0,
            grid=(num_tiles,),
            in_specs=[pl.BlockSpec((tile_rows, LANES), lambda i: (i, 0))],
            out_specs=pl.BlockSpec((2, LANES), lambda i: (0, 0)),
        ),
        compiler_params=pltpu.CompilerParams(dimension_semantics=("arbitrary",)),
        cost_estimate=pl.CostEstimate(
            flops=3 * rows_padded * LANES,
            transcendentals=0,
            bytes_accessed=rows_padded * LANES * itemsize + 2 * LANES * 4),
    )(x2d)

    # Tiny cross-lane finish + scalar math in plain XLA.
    # Note: one-pass sum/sumsq accumulated in f32 — fine at these sizes; a
    # compensated / two-pass reduction would be more robust for huge
    # low-variance tensors.
    total_sum = jnp.sum(stats[0])
    total_sumsq = jnp.sum(stats[1])
    data_mean = total_sum / n_true
    var = jnp.maximum(total_sumsq - n_true * data_mean * data_mean, 0.0) / (n_true - 1)
    std = jnp.sqrt(var)                                  # unbiased, like torch.std
    mean_used = data_mean if mean is None else jnp.float32(mean)
    params = jnp.stack([1.0 / std, mean_used]).astype(jnp.float32)
    seed_arr = jnp.asarray([seed], dtype=jnp.int32)

    # ---- phase 2: tiled elementwise RNG + mask (fully parallel grid axis) ------
    kernel = functools.partial(_mask_kernel, erf_arg_scale=erf_arg_scale,
                               tile_rows=tile_rows)
    out2d = pl.pallas_call(
        kernel,
        out_shape=jax.ShapeDtypeStruct((rows_padded, LANES), dtype),
        grid_spec=pltpu.PrefetchScalarGridSpec(
            num_scalar_prefetch=2,                   # seed + [1/std, mean] land in SMEM
            grid=(num_tiles,),
            in_specs=[pl.BlockSpec((tile_rows, LANES), lambda i, s, p: (i, 0))],
            out_specs=pl.BlockSpec((tile_rows, LANES), lambda i, s, p: (i, 0)),
        ),
        compiler_params=pltpu.CompilerParams(dimension_semantics=("parallel",)),
        cost_estimate=pl.CostEstimate(
            flops=30 * rows_padded * LANES,
            transcendentals=2 * rows_padded * LANES,
            bytes_accessed=2 * rows_padded * LANES * itemsize),
    )(seed_arr, params, x2d)

    return out2d.reshape(-1)[:n_true].reshape(orig_shape)


if __name__ == "__main__":
    key = jax.random.PRNGKey(0)
    x = jax.random.normal(key, (2, 4, 16, 16), dtype=jnp.float32)   # NCHW

    out = rand_sparse(x, seed=0, avg_percent_activation=0.05)
    out = jax.block_until_ready(out)

    # Sanity: shape/dtype preserved, kept values pass through exactly, and the
    # mask actually zeroed something (keep probability < 50% per element).
    assert out.shape == x.shape and out.dtype == x.dtype
    kept = out != 0.0
    assert bool(jnp.all(jnp.where(kept, out == x, True)))
    assert bool(jnp.any(~kept))

    print("KERNEL_OK")
</pallas_src>

<mosaic_0001>
module attributes {stable_mosaic.version = 11 : i64} {
  func.func @_stats_kernel(%arg0: i32, %arg1: memref<16x128xf32, #tpu.memory_space<vmem>>, %arg2: memref<2x128xf32, #tpu.memory_space<vmem>>) attributes {dimension_semantics = [#tpu.dimension_semantics<arbitrary>], iteration_bounds = array<i64: 1>, scalar_prefetch = 0 : i64, scratch_operands = 0 : i64, tpu.core_type = #tpu.core_type<tc>, window_params = [{transform_indices = @transform_0, window_bounds = array<i64: 16, 128>}, {pipeline_mode = #tpu.pipeline_mode<synchronous>, transform_indices = @transform_1, window_bounds = array<i64: 2, 128>}]} {
    %c0_i32 = arith.constant 0 : i32
    %0 = arith.cmpi eq, %arg0, %c0_i32 : i32
    %1 = arith.extui %0 : i1 to i32
    %c0_i32_0 = arith.constant 0 : i32
    %2 = arith.cmpi ne, %1, %c0_i32_0 : i32
    scf.if %2 {
      %cst_7 = arith.constant 0.000000e+00 : f32
      %13 = vector.broadcast %cst_7 : f32 to vector<2x128xf32>
      %c0_8 = arith.constant 0 : index
      %c0_9 = arith.constant 0 : index
      %14 = vector.load %arg2[%c0_8, %c0_9] : memref<2x128xf32, #tpu.memory_space<vmem>>, vector<2x128xf32>
      tpu.vector_store %arg2[%c0_8, %c0_9], %13 {strides = array<i32>} : memref<2x128xf32, #tpu.memory_space<vmem>>, vector<2x128xf32>,
    } else {
    }
    %c0 = arith.constant 0 : index
    %c0_1 = arith.constant 0 : index
    %3 = vector.load %arg1[%c0, %c0_1] : memref<16x128xf32, #tpu.memory_space<vmem>>, vector<16x128xf32>
    %cst = arith.constant dense<0.000000e+00> : vector<128xf32>
    %4 = vector.multi_reduction <add>, %3, %cst [0] : vector<16x128xf32> to vector<128xf32>
    %5 = vector.shape_cast %4 : vector<128xf32> to vector<1x128xf32>
    %6 = arith.mulf %3, %3 : vector<16x128xf32>
    %cst_2 = arith.constant dense<0.000000e+00> : vector<128xf32>
    %7 = vector.multi_reduction <add>, %6, %cst_2 [0] : vector<16x128xf32> to vector<128xf32>
    %8 = vector.shape_cast %7 : vector<128xf32> to vector<1x128xf32>
    %9 = tpu.concatenate %5, %8 in 0 : vector<1x128xf32>, vector<1x128xf32> -> vector<2x128xf32>
    %c0_3 = arith.constant 0 : index
    %c0_4 = arith.constant 0 : index
    %10 = vector.load %arg2[%c0_3, %c0_4] : memref<2x128xf32, #tpu.memory_space<vmem>>, vector<2x128xf32>
    %11 = arith.addf %10, %9 : vector<2x128xf32>
    %c0_5 = arith.constant 0 : index
    %c0_6 = arith.constant 0 : index
    %12 = vector.load %arg2[%c0_5, %c0_6] : memref<2x128xf32, #tpu.memory_space<vmem>>, vector<2x128xf32>
    tpu.vector_store %arg2[%c0_5, %c0_6], %11 {strides = array<i32>} : memref<2x128xf32, #tpu.memory_space<vmem>>, vector<2x128xf32>,
    return
  }
  func.func @transform_0(%arg0: i32) -> (i32, i32) {
    %c0_i32 = arith.constant 0 : i32
    %c0_i32_0 = arith.constant 0 : i32
    return %arg0, %c0_i32 : i32, i32
  }
  func.func @transform_1(%arg0: i32) -> (i32, i32) {
    %c0_i32 = arith.constant 0 : i32
    %c0_i32_0 = arith.constant 0 : i32
    %c0_i32_1 = arith.constant 0 : i32
    return %c0_i32, %c0_i32_0 : i32, i32
  }
}

</mosaic_0001>

<bundles_post_ra>
// kernel: tpu_custom_call.1
= control target key start
LH: loop header
LB: loop body
LE: loop exit
PB: predicated region body
PF: predicated region fallthrough
CT: control target
= control target key end

     0   :  { %6 = vsyncpa [#allocation3], 0  ;;  %s136_s0 = inlined_call_operand.hbm [shape: f32[16,128], index: 0, kind: input, shape index: {}]   ;;  %s137_s1 = inlined_call_operand.hbm [shape: f32[2,128], index: 1, kind: output, shape index: {}]  }
   0x1   :  { %7 = vsyncpa [#allocation4], 0  ;;  %s115_s6 = smov [#allocation2]  }
   0x2   :  { %s13_s7 = sshll.u32 %s115_s6, 4  ;;  %s14_s7 = int_to_ptr.vmem [resolvable:$true] %s13_s7 }
   0x3   :  { %s79_s8 = scalar_lea.vmem %s14_s7, 256  ;;  %p84_p1 = scmp.lt.s32.totalorder %s14_s7, %s14_s7 }
   0x4   :  { %p80_p0 = scmp.ne.s32.totalorder %s14_s7, %s79_s8  ;;  %p85_p2 = scmp.lt.s32.totalorder %s79_s8, %s79_s8 }
   0x6   :  { %p86_p3 = por %p85_p2, %p84_p1 }
   0x8   :  { %p87_p4 = pnand %p86_p3, %p80_p0 }
   0xa   :  { %90 = shalt.err (!%p87_p4)
}
   0xb   :  { %s116_s9 = smov 128   ;;  %s117_s10 = smov 8  }
   0xc   :  { %19 = dma.hbm_to_vmem [thread:$0]  %s136_s0, 256, %s14_s7, [#allocation3], %s116_s9, %s116_s9, %s117_s10  }
   0xd   :  { %111 = dma.done.wait [#allocation3], 256  }
   0xe   :  { %112 = vsyncadd [#allocation3], 4294967040  ;;  %v118_v0 = vmov 0.0   ;;  %v28_v1 = vld [vmem:[#allocation2] sm:$0xff]  ;;  %v29_v2 = vld [vmem:[#allocation2 + $0x8] sm:$0xff]  ;;  %vm46_vm0 = vcmask 1040384  }
   0xf   :  { %27 = vst [vmem:[#allocation5] sm:$0x3] %v118_v0  ;;  %v30_v3 = vadd.f32 %v29_v2, %v28_v1  ;;  %v37_v4 = vmul.f32 %v28_v1, %v28_v1  ;;  %v38_v5 = vmul.f32 %v29_v2, %v29_v2  ;;  %s119_s0 = smov [#allocation5]  }
  0x10   :  { %s57_s13 = sshll.u32 %s119_s0, 4  ;;  %s58_s13 = int_to_ptr.vmem [resolvable:$true] %s57_s13 }
  0x11   :  { %v31_v6 = vrot.slane %v30_v3, 4  ;;  %v39_v7 = vadd.f32 %v38_v5, %v37_v4  ;;  %s91_s14 = scalar_lea.vmem %s58_s13, 32  ;;  %p96_p6 = scmp.lt.s32.totalorder %s58_s13, %s58_s13 }
  0x12   :  { %p92_p5 = scmp.ne.s32.totalorder %s58_s13, %s91_s14  ;;  %p97_p7 = scmp.lt.s32.totalorder %s91_s14, %s91_s14 }
  0x13   :  { %v32_v8 = vadd.f32 %v31_v6, %v30_v3  ;;  %v40_v9 = vrot.slane %v39_v7, 4 }
  0x14   :  { %p98_p8 = por %p97_p7, %p96_p6 }
  0x15   :  { %v33_v10 = vrot.slane %v32_v8, 2  ;;  %v41_v11 = vadd.f32 %v40_v9, %v39_v7 }
  0x16   :  { %v48_v19 = vld [vmem:[#allocation5] sm:$0x3]  ;;  %p99_p9 = pnand %p98_p8, %p92_p5 }
  0x17   :  { %v34_v12 = vadd.f32 %v33_v10, %v32_v8  ;;  %v42_v13 = vrot.slane %v41_v11, 2 }
  0x19   :  { %v35_v14 = vrot.slane %v34_v12, 1  ;;  %v43_v15 = vadd.f32 %v42_v13, %v41_v11 }
  0x1b   :  { %v36_v16 = vadd.f32 %v35_v14, %v34_v12  ;;  %v44_v17 = vrot.slane %v43_v15, 1 }
  0x1d   :  { %v45_v18 = vadd.f32 %v44_v17, %v43_v15 }
  0x1f   :  { %v47_v20 = vsel %vm46_vm0, %v36_v16, %v45_v18 }
  0x20   :  { %v49_v21 = vadd.f32 %v48_v19, %v47_v20 }
  0x22   :  { %50 = vst [vmem:[#allocation5] sm:$0x3] %v49_v21 }
  0x23   :  { %102 = shalt.err (!%p99_p9)
}
  0x24   :  { %60 = dma.vmem_to_hbm [thread:$0]  %s58_s13, 32, %s137_s1, [#allocation4]  }
  0x25   :  { %113 = dma.done.wait [#allocation4], 32  }
  0x26   :  { %114 = vsyncadd [#allocation4], 4294967264 }
  0x27   :  { %64 = vsyncpa [#allocation3], 1 }
  0x28   :  { %65 = vsyncpa [#allocation4], 1 }

</bundles_post_ra>
